<compile_context>
chip_gen: v7x
topology: tpu7x:2x2x1
jax: 0.10.0
libtpu: 0.0.40
codegen_flags: <defaults>
</compile_context>

<pallas_src>
import functools

import jax
import jax.numpy as jnp
from jax import lax
from jax.experimental import pallas as pl
from jax.experimental.pallas import tpu as pltpu


def _round_up(a, b):
    return ((a + b - 1) // b) * b


def _embedding_kernel(idx_ref, table_ref, out_ref, *, num_class, pack):
    """One grid step: embed `rows * pack` tokens.

    idx_ref  : (rows, pack) int32                  pack token ids per output row
    table_ref: (pack*num_class, pack*D)            block-diagonal expanded table
    out_ref  : (rows, pack*D)                      lane-dense output tile
    """
    ids = idx_ref[...]                                    # (rows, pack) int32
    rows = ids.shape[0]
    pv = pack * num_class

    # Out-of-range ids (a negative padding_class, or the ids used to pad the
    # ragged tail) must select nothing: remap them past the last one-hot column
    # so they can never alias another pack-group's column range.
    valid = jnp.logical_and(ids >= 0, ids < num_class)
    ids = jnp.where(valid, ids, pv)

    # One-hot over the expanded class axis, built once per tile directly in the
    # matmul input dtype (single cast, no int32->f32 extra pass).
    col = lax.broadcasted_iota(jnp.int32, (rows, pv), 1)
    hit = col == ids[:, 0:1]
    for g in range(1, pack):
        hit = jnp.logical_or(hit, col == ids[:, g:g + 1] + g * num_class)
    onehot = hit.astype(table_ref.dtype)                  # (rows, pack*num_class)

    # MXU gather: each output row packs `pack` token embeddings side by side.
    # Padding rows are already zero in the table, so no extra mask multiply.
    out_ref[...] = jnp.dot(
        onehot, table_ref[...], preferred_element_type=jnp.float32
    ).astype(out_ref.dtype)


def custom_embedding_forward(x, table, padding_class, *, tokens_per_tile=512):
    """x: (B, S) int ids, table: (num_class, D) -> (B, S, D) embeddings.

    Matches custom_embedding_layer.forward: rows where x == padding_class are 0.
    """
    B, S = x.shape
    num_class, D = table.shape
    N = B * S
    itemsize = jnp.dtype(table.dtype).itemsize

    # ---- Fold the padding mask into the weights (one tiny wrapper op) ------
    if 0 <= padding_class < num_class:
        table = table.at[padding_class].set(0)
    # (a padding_class outside [0, num_class) matches no one-hot column anyway)

    # ---- Lane-dense packing: `pack` tokens per 128-lane output row ---------
    if D < 128 and 128 % D == 0:
        pack = min(128 // D, 8)
    else:
        pack = 1
    if pack * num_class > 4096:            # keep the expanded table small
        pack = 1
    # TODO(synk): for large vocabularies (num_class >~ 4k) replace the one-hot
    # matmul with a scalar-prefetch + DMA row gather (table left in HBM via
    # pl.ANY, double-buffered pltpu.make_async_copy); the one-hot path is only
    # sensible for small class counts like this module's.
    pd = pack * D
    pv = pack * num_class

    # Block-diagonal expanded table: row g*V + v carries table[v] in lane block
    # g, so `onehot @ table_exp` lays `pack` embeddings side by side per row.
    if pack > 1:
        table_exp = jnp.kron(jnp.eye(pack, dtype=table.dtype), table)  # (pv, pd)
    else:
        table_exp = table

    # ---- Token tiling -------------------------------------------------------
    rows_total = -(-N // pack)                                 # packed rows
    rows_per_tile = _round_up(max(8, tokens_per_tile // pack), 8)
    if rows_total <= rows_per_tile:
        rows_padded = _round_up(rows_total, 8)                 # single tile
        rows_per_tile = rows_padded
    else:
        rows_padded = _round_up(rows_total, rows_per_tile)

    pad_tokens = rows_padded * pack - N
    idx_flat = x.reshape(N).astype(jnp.int32)
    if pad_tokens:
        # Only the 4-byte ids are padded; padded slots embed to zero rows and
        # are sliced off after the (free) reshape below.
        idx_flat = jnp.pad(idx_flat, (0, pad_tokens),
                           constant_values=padding_class)
    idx2d = idx_flat.reshape(rows_padded, pack)

    grid = (rows_padded // rows_per_tile,)
    kernel = functools.partial(_embedding_kernel,
                               num_class=num_class, pack=pack)

    # NOTE(v7x): the (pv, pd) table block is resident (constant index map) and
    # double-buffered by Pallas; for big tables budget it against 64 MiB VMEM
    # (pl.Buffered(1) / class tiling / the gather TODO above).
    out_packed = pl.pallas_call(
        kernel,
        out_shape=jax.ShapeDtypeStruct((rows_padded, pd), table.dtype),
        grid_spec=pltpu.PrefetchScalarGridSpec(
            num_scalar_prefetch=0,
            grid=grid,
            in_specs=[
                pl.BlockSpec((rows_per_tile, pack), lambda i: (i, 0)),  # ids
                pl.BlockSpec((pv, pd), lambda i: (0, 0)),               # table
            ],
            out_specs=pl.BlockSpec((rows_per_tile, pd), lambda i: (i, 0)),
        ),
        compiler_params=pltpu.CompilerParams(
            dimension_semantics=("parallel",)),
        # Embedding lookup is HBM-bandwidth bound, not a heavy matmul: report
        # the real byte traffic to the XLA scheduler.
        cost_estimate=pl.CostEstimate(
            flops=2 * rows_padded * pv * pd,
            transcendentals=0,
            bytes_accessed=(rows_padded * pd * itemsize          # output
                            + rows_padded * pack * 4             # ids
                            + pv * pd * itemsize)),              # table
    )(idx2d, table_exp)

    # (rows_padded, pack*D) -> (rows_padded*pack, D) is a free row-major
    # metadata reshape; slice only when the token count was not tile aligned.
    out_flat = out_packed.reshape(rows_padded * pack, D)
    if pad_tokens:
        out_flat = out_flat[:N]
    return out_flat.reshape(B, S, D)


def reference_forward(x, table, padding_class):
    emb = jnp.take(table, x, axis=0)                      # (B, S, D)
    mask = (x != padding_class)[..., None]
    return jnp.where(mask, emb, 0.0)


if __name__ == "__main__":
    # Module config (small shapes consistent with the forward pass)
    padding_class = 0
    num_class = 16
    embedded_dim = 32
    B, S = 2, 8

    key = jax.random.PRNGKey(0)
    k_table, k_x, k_x2 = jax.random.split(key, 3)

    # Deterministic "nn.Embedding" weight (N(0,1), like the PyTorch default)
    table = jax.random.normal(k_table, (num_class, embedded_dim),
                              dtype=jnp.float32)

    # Token ids, including some padding_class entries
    x = jax.random.randint(k_x, (B, S), 0, num_class, dtype=jnp.int32)

    out = jax.block_until_ready(custom_embedding_forward(x, table, padding_class))
    ref = reference_forward(x, table, padding_class)
    assert out.shape == (B, S, embedded_dim)
    assert jnp.allclose(out, ref, atol=1e-5, rtol=1e-5), "mismatch vs reference"

    # Also exercise the multi-tile (grid > 1) + ragged-tail path.
    B2, S2 = 3, 257                                       # 771 tokens -> 2 tiles
    x2 = jax.random.randint(k_x2, (B2, S2), 0, num_class, dtype=jnp.int32)
    out2 = jax.block_until_ready(custom_embedding_forward(x2, table, padding_class))
    ref2 = reference_forward(x2, table, padding_class)
    assert jnp.allclose(out2, ref2, atol=1e-5, rtol=1e-5), "mismatch (tiled case)"

    print("KERNEL_OK")
</pallas_src>

<mosaic_0001>
module attributes {stable_mosaic.version = 11 : i64} {
  func.func @_embedding_kernel(%arg0: i32, %arg1: memref<8x4xi32, #tpu.memory_space<vmem>>, %arg2: memref<64x128xf32, #tpu.memory_space<vmem>>, %arg3: memref<8x128xf32, #tpu.memory_space<vmem>>) attributes {dimension_semantics = [#tpu.dimension_semantics<parallel>], iteration_bounds = array<i64: 1>, scalar_prefetch = 0 : i64, scratch_operands = 0 : i64, tpu.core_type = #tpu.core_type<tc>, window_params = [{transform_indices = @transform_0, window_bounds = array<i64: 8, 4>}, {pipeline_mode = #tpu.pipeline_mode<synchronous>, transform_indices = @transform_1, window_bounds = array<i64: 64, 128>}, {transform_indices = @transform_2, window_bounds = array<i64: 8, 128>}]} {
    %c0 = arith.constant 0 : index
    %c0_0 = arith.constant 0 : index
    %0 = vector.load %arg1[%c0, %c0_0] : memref<8x4xi32, #tpu.memory_space<vmem>>, vector<8x4xi32>
    %c0_i32 = arith.constant 0 : i32
    %1 = vector.broadcast %c0_i32 : i32 to vector<8x4xi32>
    %2 = arith.cmpi sge, %0, %1 : vector<8x4xi32>
    %c16_i32 = arith.constant 16 : i32
    %3 = vector.broadcast %c16_i32 : i32 to vector<8x4xi32>
    %4 = arith.cmpi slt, %0, %3 : vector<8x4xi32>
    %5 = arith.andi %2, %4 : vector<8x4xi1>
    %c64_i32 = arith.constant 64 : i32
    %6 = vector.broadcast %c64_i32 : i32 to vector<8x4xi32>
    %7 = arith.select %5, %0, %6 : vector<8x4xi1>, vector<8x4xi32>
    %8 = tpu.iota {dimensions = array<i32: 1>} : vector<8x64xi32>
    %9 = vector.extract_strided_slice %7 {offsets = [0, 0], sizes = [8, 1], strides = [1, 1]} : vector<8x4xi32> to vector<8x1xi32>
    %10 = vector.broadcast %9 : vector<8x1xi32> to vector<8x64xi32>
    %11 = arith.cmpi eq, %8, %10 : vector<8x64xi32>
    %12 = vector.extract_strided_slice %7 {offsets = [0, 1], sizes = [8, 1], strides = [1, 1]} : vector<8x4xi32> to vector<8x1xi32>
    %c16_i32_1 = arith.constant 16 : i32
    %13 = vector.broadcast %c16_i32_1 : i32 to vector<8x1xi32>
    %14 = arith.addi %12, %13 : vector<8x1xi32>
    %15 = vector.broadcast %14 : vector<8x1xi32> to vector<8x64xi32>
    %16 = arith.cmpi eq, %8, %15 : vector<8x64xi32>
    %17 = arith.ori %11, %16 : vector<8x64xi1>
    %18 = vector.extract_strided_slice %7 {offsets = [0, 2], sizes = [8, 1], strides = [1, 1]} : vector<8x4xi32> to vector<8x1xi32>
    %c32_i32 = arith.constant 32 : i32
    %19 = vector.broadcast %c32_i32 : i32 to vector<8x1xi32>
    %20 = arith.addi %18, %19 : vector<8x1xi32>
    %21 = vector.broadcast %20 : vector<8x1xi32> to vector<8x64xi32>
    %22 = arith.cmpi eq, %8, %21 : vector<8x64xi32>
    %23 = arith.ori %17, %22 : vector<8x64xi1>
    %24 = vector.extract_strided_slice %7 {offsets = [0, 3], sizes = [8, 1], strides = [1, 1]} : vector<8x4xi32> to vector<8x1xi32>
    %c48_i32 = arith.constant 48 : i32
    %25 = vector.broadcast %c48_i32 : i32 to vector<8x1xi32>
    %26 = arith.addi %24, %25 : vector<8x1xi32>
    %27 = vector.broadcast %26 : vector<8x1xi32> to vector<8x64xi32>
    %28 = arith.cmpi eq, %8, %27 : vector<8x64xi32>
    %29 = arith.ori %23, %28 : vector<8x64xi1>
    %30 = arith.extui %29 : vector<8x64xi1> to vector<8x64xi32>
    %31 = arith.sitofp %30 : vector<8x64xi32> to vector<8x64xf32>
    %c0_2 = arith.constant 0 : index
    %c0_3 = arith.constant 0 : index
    %32 = vector.load %arg2[%c0_2, %c0_3] : memref<64x128xf32, #tpu.memory_space<vmem>>, vector<64x128xf32>
    %cst = arith.constant dense<0.000000e+00> : vector<8x128xf32>
    %33 = tpu.matmul %31, %32, %cst {dimension_numbers = #tpu.dot_dimension_numbers<[1], [0], [0], [1], [0, 0, 1, 1], [], []>} : vector<8x64xf32>, vector<64x128xf32>, vector<8x128xf32> -> vector<8x128xf32>
    %c0_4 = arith.constant 0 : index
    %c0_5 = arith.constant 0 : index
    %34 = vector.load %arg3[%c0_4, %c0_5] : memref<8x128xf32, #tpu.memory_space<vmem>>, vector<8x128xf32>
    tpu.vector_store %arg3[%c0_4, %c0_5], %33 {strides = array<i32>} : memref<8x128xf32, #tpu.memory_space<vmem>>, vector<8x128xf32>,
    return
  }
  func.func @transform_0(%arg0: i32) -> (i32, i32) {
    %c0_i32 = arith.constant 0 : i32
    %c0_i32_0 = arith.constant 0 : i32
    return %arg0, %c0_i32 : i32, i32
  }
  func.func @transform_1(%arg0: i32) -> (i32, i32) {
    %c0_i32 = arith.constant 0 : i32
    %c0_i32_0 = arith.constant 0 : i32
    %c0_i32_1 = arith.constant 0 : i32
    return %c0_i32, %c0_i32_0 : i32, i32
  }
  func.func @transform_2(%arg0: i32) -> (i32, i32) {
    %c0_i32 = arith.constant 0 : i32
    %c0_i32_0 = arith.constant 0 : i32
    return %arg0, %c0_i32 : i32, i32
  }
}

</mosaic_0001>

<bundles_post_ra>
// kernel: tpu_custom_call.1
= control target key start
LH: loop header
LB: loop body
LE: loop exit
PB: predicated region body
PF: predicated region fallthrough
CT: control target
= control target key end

     0   :  { %7 = vsyncpa [#allocation3], 0  ;;  %s314_s0 = inlined_call_operand.vmem [shape: s32[8,4], index: 0, kind: input, shape index: {}]   ;;  %s315_s1 = inlined_call_operand.hbm [shape: f32[64,128], index: 1, kind: input, shape index: {}]   ;;  %s316_s2 = inlined_call_operand.hbm [shape: f32[8,128], index: 2, kind: output, shape index: {}]  }
   0x1   :  { %8 = vsyncpa [#allocation4], 0  ;;  %s261_s9 = smov [#allocation2]   ;;  %s213_s13 = scalar_lea.hbm %s315_s1, 1024 }
   0x2   :  { %s16_s10 = sshll.u32 %s261_s9, 4  ;;  %p214_p0 = scmp.ne.s32.totalorder %s315_s1, %s213_s13  ;;  %s17_s10 = int_to_ptr.vmem [resolvable:$true] %s16_s10 }
   0x3   :  { %p217_p1 = scmp.lt.u32.totalorder %s213_s13, %s315_s1 }
   0x5   :  { %p219_p2 = pnand %p217_p1, %p214_p0 }
   0x7   :  { %222 = shalt.err (!%p219_p2)
}
   0x8   :  { %s223_s18 = scalar_lea.vmem %s17_s10, 1024  ;;  %p228_p4 = scmp.lt.s32.totalorder %s17_s10, %s17_s10 }
   0x9   :  { %p224_p3 = scmp.ne.s32.totalorder %s17_s10, %s223_s18  ;;  %p229_p5 = scmp.lt.s32.totalorder %s223_s18, %s223_s18 }
   0xb   :  { %p230_p6 = por %p229_p5, %p228_p4 }
   0xd   :  { %p231_p7 = pnand %p230_p6, %p224_p3 }
   0xf   :  { %234 = shalt.err (!%p231_p7)
}
  0x10   :  { %s262_s19 = smov 128   ;;  %s263_s20 = smov 8  }
  0x11   :  { %22 = dma.hbm_to_vmem [thread:$0]  %s315_s1, 1024, %s17_s10, [#allocation3], %s262_s19, %s262_s19, %s263_s20  }
  0x12   :  { %257 = dma.done.wait [#allocation3], 1024  }
  0x13   :  { %258 = vsyncadd [#allocation3], 4294966272  ;;  %v264_v0 = vmov 0   ;;  %v265_v1 = vmov 2   ;;  %v266_v2 = vmov 0.0|0.0   ;;  %v26_v3 = vld [vmem:[%s314_s0] sm:$0xff]  ;;  %v31_v23 = vlaneseq }
  0x14   :  { %208 = vset.pattern.permute.xlu0 %v264_v0  ;;  %210 = vset.pattern.permute.xlu1 %v265_v1  ;;  %v57_v4 = vld [vmem:[#allocation2] sm:$0xff]  ;;  %v58_v5 = vld [vmem:[#allocation2 + $0x8] sm:$0xff]  ;;  %vm27_vm0 = vcmp.ge.s32.totalorder %v26_v3, 0  ;;  %vm28_vm1 = vcmp.lt.s32.totalorder %v26_v3, 16  ;;  %v59_v7 = vld [vmem:[#allocation2 + $0x10] sm:$0xff]  ;;  %v267_v17 = vmov 1  }
  0x15   :  { %185 = vmatprep.subr.bf16.mxu0 %v266_v2  ;;  %v186_v6 = vpack.c.bf16 %v58_v5, %v57_v4  ;;  %v60_v8 = vld [vmem:[#allocation2 + $0x18] sm:$0xff]  ;;  %vm29_vm2 = vmand %vm27_vm0, %vm28_vm1  ;;  %v61_v12 = vld [vmem:[#allocation2 + $0x20] sm:$0xff]  ;;  %v268_v20 = vmov 3   ;;  %vm269_vm3 = vmmov 0   ;;  %v270_v22 = vmov 0.0   ;;  %s271_s0 = smov [#allocation5]  }
  0x16   :  { %v30_v9 = vsel %vm29_vm2, %v26_v3, 64  ;;  %v189_v10 = vpack.c.bf16 %v60_v8, %v59_v7  ;;  %v62_v13 = vld [vmem:[#allocation2 + $0x28] sm:$0xff]  ;;  %v63_v18 = vld [vmem:[#allocation2 + $0x30] sm:$0xff]  ;;  %v64_v19 = vld [vmem:[#allocation2 + $0x38] sm:$0xff]  ;;  %182 = vmatprep.mubr.msk.f32.mxu0 %vm269_vm3, %v270_v22  ;;  %v32_v25 = vand.u32 127, %v31_v23  ;;  %vm65_vm10 = vcmask 523264  }
  0x17   :  { %187 = vmatpush3.bf16.msra.mxu0 %v186_v6  ;;  %34 = vperm.xlu0 %208, %v30_v9   ;;  %v43_v11 = vadd.s32 32, %v30_v9  ;;  %v37_v14 = vadd.s32 16, %v30_v9  ;;  %v49_v15 = vadd.s32 48, %v30_v9  ;;  %v192_v16 = vpack.c.bf16 %v62_v13, %v61_v12  ;;  %s146_s1 = sshll.u32 %s271_s0, 4  ;;  %s147_s1 = int_to_ptr.vmem [resolvable:$true] %s146_s1 }
  0x18   :  { %188 = vmatprep.subr.bf16.mxu0 %v266_v2  ;;  %v195_v21 = vpack.c.bf16 %v64_v19, %v63_v18  ;;  %s235_s25 = scalar_lea.vmem %s147_s1, 128  ;;  %p240_p9 = scmp.lt.s32.totalorder %s147_s1, %s147_s1 }
  0x19   :  { %45 = vperm.xlu1 %210, %v43_v11   ;;  %p236_p8 = scmp.ne.s32.totalorder %s147_s1, %s235_s25  ;;  %p241_p10 = scmp.lt.s32.totalorder %s235_s25, %s235_s25 }
  0x1b   :  { %190 = vmatpush3.bf16.msra.mxu0 %v189_v10  ;;  %209 = vset.pattern.permute.xlu0 %v267_v17  ;;  %p242_p11 = por %p241_p10, %p240_p9 }
  0x1c   :  { %191 = vmatprep.subr.bf16.mxu0 %v266_v2  ;;  %39 = vperm.xlu0 %209, %v37_v14  }
  0x1d   :  { %211 = vset.pattern.permute.xlu1 %v268_v20  ;;  %p243_p12 = pnand %p242_p11, %p236_p8 }
  0x1e   :  { %51 = vperm.xlu1 %211, %v49_v15  }
  0x1f   :  { %193 = vmatpush3.bf16.msra.mxu0 %v192_v16 }
  0x20   :  { %194 = vmatprep.subr.bf16.mxu0 %v266_v2  ;;  %212 = vset.pattern.permute.xlu0 %v268_v20 }
  0x23   :  { %196 = vmatpush3.bf16.msra.mxu0 %v195_v21 }
  0x96   :  { %v35_v24 = vpop.permute.xlu0 %34 }
  0x97   :  { %vm36_vm4 = vcmp.eq.s32.totalorder %v32_v25, %v35_v24 }
  0x98   :  { %v46_v26 = vpop.permute.xlu1 %45 }
  0x99   :  { %vm47_vm6 = vcmp.eq.s32.totalorder %v32_v25, %v46_v26 }
  0x9b   :  { %v40_v27 = vpop.permute.xlu0 %39 }
  0x9c   :  { %vm41_vm5 = vcmp.eq.s32.totalorder %v32_v25, %v40_v27 }
  0x9d   :  { %vm42_vm7 = vmor %vm36_vm4, %vm41_vm5  ;;  %v52_v28 = vpop.permute.xlu1 %51 }
  0x9e   :  { %vm48_vm8 = vmor %vm42_vm7, %vm47_vm6  ;;  %vm53_vm9 = vcmp.eq.s32.totalorder %v32_v25, %v52_v28 }
  0x9f   :  { %vm54_vm11 = vmor %vm48_vm8, %vm53_vm9 }
  0xa0   :  { %v155_v29 = vsel %vm54_vm11, 1.0, %v270_v22 }
  0xa1   :  { %183 = vmatmul.mubr.msk.f32.vlgmr.msra.gmra.mrb[0].mxu0 %vm65_vm10, %v155_v29 }
 0x174   :  { %v135_v30 = vpop.f32.mrb[0].mxu0 }
 0x175   :  { %139 = vst [vmem:[#allocation5] sm:$0xff] %v135_v30  ;;  %v184_v31 = vpop.f32.mrb[1].mxu0 }
 0x176   :  { %246 = shalt.err (!%p243_p12)
}
 0x177   :  { %s247_s28 = scalar_lea.hbm %s316_s2, 128 }
 0x178   :  { %p248_p13 = scmp.ne.s32.totalorder %s316_s2, %s247_s28  ;;  %p251_p0 = scmp.lt.u32.totalorder %s247_s28, %s316_s2 }
 0x17a   :  { %p253_p1 = pnand %p251_p0, %p248_p13 }
 0x17c   :  { %256 = shalt.err (!%p253_p1)
}
 0x17d   :  { %149 = dma.vmem_to_hbm [thread:$0]  %s147_s1, 128, %s316_s2, [#allocation4]  }
 0x17e   :  { %259 = dma.done.wait [#allocation4], 128  }
 0x17f   :  { %260 = vsyncadd [#allocation4], 4294967168 }
 0x180   :  { %153 = vsyncpa [#allocation3], 1 }
 0x181   :  { %154 = vsyncpa [#allocation4], 1 }

</bundles_post_ra>
